<compile_context>
chip_gen: v6e
topology: v6e:2x2x1
jax: 0.10.0
libtpu: 0.0.40
codegen_flags: <defaults>
</compile_context>

<pallas_src>
import functools

import numpy as np
import jax
import jax.numpy as jnp
from jax import lax
from jax.experimental import pallas as pl
from jax.experimental.pallas import tpu as pltpu


def _upconv_kernel(xu_ref, halo_ref, w_ref, b_ref, a_ref, o_ref, *, W, TR):
    """One (batch, row-block) grid step.

    xu_ref:   (1, C, L2)     column-upsampled input rows (even lanes = x, odd lanes = 0)
    halo_ref: (1, 1, C, 2W)  column-upsampled NEXT input row (zeros past the image)
    w_ref:    (9, C, C)      per-tap (C_out, C_in) matrices (resident)
    b_ref:    (C, 1)         f32 bias (resident)
    a_ref:    (1, 1)         f32 PReLU slope (SMEM scalar)
    o_ref:    (1, C, 2*L2)   two px-interleaved output rows per input row
    """
    W2 = 2 * W
    L2 = W2 * TR

    x0 = xu_ref[0]                      # (C, L2), compute dtype
    h = halo_ref[0, 0]                  # (C, 2W)
    Cin = x0.shape[0]
    dt = x0.dtype

    zcol = jnp.zeros((Cin, 1), dt)
    lane = lax.broadcasted_iota(jnp.int32, (1, L2), 1)
    row_end = (lane % W2) == (W2 - 1)   # last (odd) lane of each upsampled row

    # Shifted views of the zero-stuffed rows.  Parity zeros are already baked in, so the
    # per-output-column (px) selection needs no in-kernel interleave:
    #   even lanes of a*  -> x[., c]      (kw = 1 taps)
    #   odd  lanes of b*  -> x[., c]      (kw = 2 taps)
    #   odd  lanes of c*  -> x[., c + 1]  (kw = 0 taps, right edge masked to 0)
    a0 = x0
    b0 = jnp.concatenate([zcol, x0[:, :-1]], axis=1)
    c0 = jnp.where(row_end, jnp.zeros((), dt),
                   jnp.concatenate([x0[:, 1:], zcol], axis=1))
    if TR == 1:
        a1 = h                                                     # next row entirely from halo
    else:
        a1 = jnp.concatenate([x0[:, W2:], h], axis=1)              # rows shifted down by one
    b1 = jnp.concatenate([zcol, a1[:, :-1]], axis=1)
    c1 = jnp.where(row_end, jnp.zeros((), dt),
                   jnp.concatenate([a1[:, 1:], zcol], axis=1))

    dot = functools.partial(jnp.dot, preferred_element_type=jnp.float32)
    # Even output rows (py = 0): taps (kh,kw) = (1,1), (1,2), (1,0)
    p0 = dot(w_ref[0], a0) + dot(w_ref[1], b0) + dot(w_ref[2], c0)
    # Odd output rows (py = 1): taps (2,1), (2,2), (2,0), (0,1), (0,2), (0,0)
    p1 = (dot(w_ref[3], a0) + dot(w_ref[4], b0) + dot(w_ref[5], c0)
          + dot(w_ref[6], a1) + dot(w_ref[7], b1) + dot(w_ref[8], c1))

    bcol = b_ref[...]                   # (C, 1) f32
    alpha = a_ref[0, 0]
    y0 = p0 + bcol
    y0 = jnp.where(y0 >= 0.0, y0, alpha * y0).astype(o_ref.dtype)
    y1 = p1 + bcol
    y1 = jnp.where(y1 >= 0.0, y1, alpha * y1).astype(o_ref.dtype)

    # Interleave py=0 / py=1 rows at 2W-chunk granularity -> block is NCHW-contiguous,
    # so the wrapper-side reshape to (N, C, 2H, 2W) is free.
    pieces = []
    for t in range(TR):
        sl = slice(t * W2, (t + 1) * W2)
        pieces.append(y0[:, sl])
        pieces.append(y1[:, sl])
    o_ref[0] = jnp.concatenate(pieces, axis=1)


def _pick_row_tile(H, W, C):
    """Largest row tile TR (TR | H, TR <= 32) whose working set fits a ~40 MiB VMEM budget.

    Budget counts double-buffered in/out blocks, the in-kernel shifted views / f32 partials
    and the resident (double-buffered) weights; lane dim 2*W*TR is kept a multiple of 128
    when possible.
    """
    budget_elems = 640 * 1024          # max C * L2 elements per block (L2 = 2*W*TR)
    divisors = sorted((d for d in range(1, H + 1) if H % d == 0), reverse=True)
    for d in divisors:                 # preferred: lane-dense blocks
        if d <= 32 and 2 * W * d * C <= budget_elems and (2 * W * d) % 128 == 0:
            return d
    for d in divisors:                 # fallback: ragged lane width, still within budget
        if d <= 32 and 2 * W * d * C <= budget_elems:
            return d
    return H                           # full-extent block (always a legal BlockSpec)


def upconvx2(x, weight, bias, alpha,
             compute_dtype=jnp.bfloat16, out_dtype=jnp.bfloat16):
    """ConvTranspose2d(C, C, kernel=3, stride=2, pad=1, output_pad=1) + PReLU.

    x: (N, C, H, W); weight: (Cin, Cout, 3, 3) (PyTorch ConvTranspose layout); bias: (C,);
    alpha: scalar PReLU slope.  Returns (N, C, 2H, 2W) NCHW in `out_dtype`.
    MXU operands use `compute_dtype` (bf16 default); accumulation and epilogue are f32.
    """
    N, C, H, W = x.shape
    TR = _pick_row_tile(H, W, C)
    nR = H // TR
    W2 = 2 * W
    L2 = W2 * TR
    cdt = compute_dtype

    # ---- wrapper-side prep (all cheap: one pad over the input + tiny halo/weight arrays) ----
    # Column-upsample (zero-stuff): xu[..., 2c] = x[..., c], odd lanes 0.
    zero = jnp.zeros((), cdt)
    xu = lax.pad(x.astype(cdt), zero,
                 ((0, 0, 0), (0, 0, 0), (0, 0, 0), (0, 1, 1)))       # (N, C, H, 2W)
    # Row halo: first (upsampled) row of the NEXT row-block; zeros past the bottom edge.
    if nR > 1:
        halo = xu[:, :, TR::TR, :]                                   # (N, C, nR-1, 2W)
        halo = jnp.pad(halo, ((0, 0), (0, 0), (0, 1), (0, 0)))
    else:
        halo = jnp.zeros((N, C, 1, W2), cdt)
    halo = jnp.transpose(halo, (0, 2, 1, 3))                         # (N, nR, C, 2W)
    xu = xu.reshape(N, C, H * W2)                                    # free reshape

    # Per-tap (C_out, C_in) weight matrices, ordered to match the kernel body.
    wf = weight.astype(jnp.float32)
    taps = [(1, 1), (1, 2), (1, 0), (2, 1), (2, 2), (2, 0), (0, 1), (0, 2), (0, 0)]
    wpk = jnp.stack([wf[:, :, kh, kw].T for kh, kw in taps], axis=0).astype(cdt)  # (9, C, C)
    bcol = bias.astype(jnp.float32).reshape(C, 1)
    a11 = jnp.asarray(alpha, jnp.float32).reshape(1, 1)

    # ---- Pallas call -------------------------------------------------------------------
    kernel = functools.partial(_upconv_kernel, W=W, TR=TR)
    out = pl.pallas_call(
        kernel,
        out_shape=jax.ShapeDtypeStruct((N, C, 4 * H * W), out_dtype),
        grid=(N, nR),
        in_specs=[
            pl.BlockSpec((1, C, L2), lambda n, r: (n, 0, r)),         # activations
            pl.BlockSpec((1, 1, C, W2), lambda n, r: (n, r, 0, 0)),   # row halo
            pl.BlockSpec((9, C, C), lambda n, r: (0, 0, 0)),          # weights (resident)
            pl.BlockSpec((C, 1), lambda n, r: (0, 0)),                # bias (resident)
            pl.BlockSpec(memory_space=pltpu.MemorySpace.SMEM),        # PReLU slope scalar
        ],
        out_specs=pl.BlockSpec((1, C, 2 * L2), lambda n, r: (n, 0, r)),
        compiler_params=pltpu.CompilerParams(
            dimension_semantics=("parallel", "parallel"),
            vmem_limit_bytes=48 * 1024 * 1024),
    )(xu, halo, wpk, bcol, a11)

    # (N, C, 4*H*W) is already NCHW-contiguous: reshape is free (no transpose).
    return out.reshape(N, C, 2 * H, 2 * W)


def _reference(x, Wt, b, alpha):
    """Naive NumPy ConvTranspose2d(k=3, s=2, p=1, op=1) + PReLU, direct scatter formula."""
    N, C, H, Wd = x.shape
    Ho, Wo = 2 * H, 2 * Wd
    out = np.zeros((N, C, Ho, Wo), np.float64)
    for n in range(N):
        for o in range(C):
            for i in range(C):
                for h in range(H):
                    for w in range(Wd):
                        v = x[n, i, h, w]
                        for kh in range(3):
                            y = h * 2 - 1 + kh
                            if y < 0 or y >= Ho:
                                continue
                            for kw in range(3):
                                xx = w * 2 - 1 + kw
                                if 0 <= xx < Wo:
                                    out[n, o, y, xx] += v * Wt[i, o, kh, kw]
            out[n, o] += b[o]
    return np.where(out >= 0, out, alpha * out)


if __name__ == "__main__":
    key = jax.random.PRNGKey(0)
    kx, kw, kb = jax.random.split(key, 3)
    N, C, H, W = 2, 4, 16, 16
    x = jax.random.normal(kx, (N, C, H, W), jnp.float32)
    # ConvTranspose2d weight (Cin, Cout, 3, 3), bias (C,), PReLU default a=0.25
    weight = jax.random.normal(kw, (C, C, 3, 3), jnp.float32) * 0.1
    bias = jax.random.normal(kb, (C,), jnp.float32) * 0.1
    alpha = 0.25

    y_ref = _reference(np.asarray(x), np.asarray(weight), np.asarray(bias), alpha)

    # Strict f32 path.
    y = jax.block_until_ready(
        upconvx2(x, weight, bias, alpha,
                 compute_dtype=jnp.float32, out_dtype=jnp.float32))
    assert y.shape == (N, C, 2 * H, 2 * W)
    np.testing.assert_allclose(np.asarray(y), y_ref, rtol=1e-4, atol=1e-4)

    # Default fast path: bf16 operands + bf16 output (f32 accumulation/epilogue inside).
    y16 = jax.block_until_ready(upconvx2(x, weight, bias, alpha))
    assert y16.shape == (N, C, 2 * H, 2 * W)
    np.testing.assert_allclose(np.asarray(y16.astype(jnp.float32)), y_ref,
                               rtol=5e-2, atol=5e-2)

    print("KERNEL_OK")
</pallas_src>

<mosaic_0001>
module attributes {stable_mosaic.version = 11 : i64} {
  func.func @_upconv_kernel(%arg0: i32, %arg1: i32, %arg2: memref<1x4x512xf32, #tpu.memory_space<vmem>>, %arg3: memref<1x1x4x32xf32, #tpu.memory_space<vmem>>, %arg4: memref<9x4x4xf32, #tpu.memory_space<vmem>>, %arg5: memref<4x1xf32, #tpu.memory_space<vmem>>, %arg6: memref<1x1xf32, #tpu.memory_space<smem>>, %arg7: memref<1x4x1024xf32, #tpu.memory_space<vmem>>) attributes {dimension_semantics = [#tpu.dimension_semantics<parallel>, #tpu.dimension_semantics<parallel>], iteration_bounds = array<i64: 2, 1>, scalar_prefetch = 0 : i64, scratch_operands = 0 : i64, tpu.core_type = #tpu.core_type<tc>, window_params = [{transform_indices = @transform_0, window_bounds = array<i64: 1, 4, 512>}, {transform_indices = @transform_1, window_bounds = array<i64: 1, 1, 4, 32>}, {pipeline_mode = #tpu.pipeline_mode<synchronous>, transform_indices = @transform_2, window_bounds = array<i64: 9, 4, 4>}, {pipeline_mode = #tpu.pipeline_mode<synchronous>, transform_indices = @transform_3, window_bounds = array<i64: 4, 1>}, {transform_indices = @transform_4, window_bounds = array<i64: 1, 1>}, {transform_indices = @transform_5, window_bounds = array<i64: 1, 4, 1024>}]} {
    %c0 = arith.constant 0 : index
    %c0_0 = arith.constant 0 : index
    %c0_1 = arith.constant 0 : index
    %0 = vector.load %arg2[%c0, %c0_0, %c0_1] : memref<1x4x512xf32, #tpu.memory_space<vmem>>, vector<1x4x512xf32>
    %1 = vector.shape_cast %0 : vector<1x4x512xf32> to vector<4x512xf32>
    %c0_2 = arith.constant 0 : index
    %c0_3 = arith.constant 0 : index
    %c0_4 = arith.constant 0 : index
    %c0_5 = arith.constant 0 : index
    %2 = vector.load %arg3[%c0_2, %c0_3, %c0_4, %c0_5] : memref<1x1x4x32xf32, #tpu.memory_space<vmem>>, vector<1x1x4x32xf32>
    %3 = vector.shape_cast %2 : vector<1x1x4x32xf32> to vector<4x32xf32>
    %cst = arith.constant 0.000000e+00 : f32
    %4 = vector.broadcast %cst : f32 to vector<4x1xf32>
    %5 = tpu.iota {dimensions = array<i32: 1>} : vector<1x512xi32>
    %c32_i32 = arith.constant 32 : i32
    %c0_i32 = arith.constant 0 : i32
    %6 = arith.cmpi eq, %c32_i32, %c0_i32 : i32
    %c1_i32 = arith.constant 1 : i32
    %7 = arith.select %6, %c1_i32, %c32_i32 : i32
    %8 = vector.broadcast %7 : i32 to vector<1x512xi32>
    %9 = arith.remsi %5, %8 : vector<1x512xi32>
    %c0_i32_6 = arith.constant 0 : i32
    %10 = vector.broadcast %c0_i32_6 : i32 to vector<1x512xi32>
    %11 = arith.cmpi ne, %9, %10 : vector<1x512xi32>
    %c0_i32_7 = arith.constant 0 : i32
    %12 = vector.broadcast %c0_i32_7 : i32 to vector<1x512xi32>
    %13 = arith.cmpi slt, %9, %12 : vector<1x512xi32>
    %c0_i32_8 = arith.constant 0 : i32
    %14 = arith.cmpi slt, %7, %c0_i32_8 : i32
    %15 = vector.broadcast %14 : i1 to vector<1x512xi1>
    %16 = vector.broadcast %15 : vector<1x512xi1> to vector<1x512xi1>
    %17 = arith.xori %13, %16 : vector<1x512xi1>
    %18 = arith.andi %17, %11 : vector<1x512xi1>
    %19 = vector.broadcast %7 : i32 to vector<1x512xi32>
    %20 = arith.addi %9, %19 : vector<1x512xi32>
    %21 = arith.select %18, %20, %9 : vector<1x512xi1>, vector<1x512xi32>
    %c31_i32 = arith.constant 31 : i32
    %22 = vector.broadcast %c31_i32 : i32 to vector<1x512xi32>
    %23 = arith.cmpi eq, %21, %22 : vector<1x512xi32>
    %24 = vector.extract_strided_slice %1 {offsets = [0, 0], sizes = [4, 511], strides = [1, 1]} : vector<4x512xf32> to vector<4x511xf32>
    %25 = tpu.concatenate %4, %24 in 1 : vector<4x1xf32>, vector<4x511xf32> -> vector<4x512xf32>
    %26 = vector.extract_strided_slice %1 {offsets = [0, 1], sizes = [4, 511], strides = [1, 1]} : vector<4x512xf32> to vector<4x511xf32>
    %27 = tpu.concatenate %26, %4 in 1 : vector<4x511xf32>, vector<4x1xf32> -> vector<4x512xf32>
    %cst_9 = arith.constant 0.000000e+00 : f32
    %28 = vector.shape_cast %23 : vector<1x512xi1> to vector<1x512xi1>
    %29 = vector.broadcast %28 : vector<1x512xi1> to vector<4x512xi1>
    %30 = vector.broadcast %cst_9 : f32 to vector<4x512xf32>
    %31 = arith.select %29, %30, %27 : vector<4x512xi1>, vector<4x512xf32>
    %32 = vector.extract_strided_slice %1 {offsets = [0, 32], sizes = [4, 480], strides = [1, 1]} : vector<4x512xf32> to vector<4x480xf32>
    %33 = tpu.concatenate %32, %3 in 1 : vector<4x480xf32>, vector<4x32xf32> -> vector<4x512xf32>
    %34 = vector.extract_strided_slice %33 {offsets = [0, 0], sizes = [4, 511], strides = [1, 1]} : vector<4x512xf32> to vector<4x511xf32>
    %35 = tpu.concatenate %4, %34 in 1 : vector<4x1xf32>, vector<4x511xf32> -> vector<4x512xf32>
    %36 = vector.extract_strided_slice %33 {offsets = [0, 1], sizes = [4, 511], strides = [1, 1]} : vector<4x512xf32> to vector<4x511xf32>
    %37 = tpu.concatenate %36, %4 in 1 : vector<4x511xf32>, vector<4x1xf32> -> vector<4x512xf32>
    %cst_10 = arith.constant 0.000000e+00 : f32
    %38 = vector.shape_cast %23 : vector<1x512xi1> to vector<1x512xi1>
    %39 = vector.broadcast %38 : vector<1x512xi1> to vector<4x512xi1>
    %40 = vector.broadcast %cst_10 : f32 to vector<4x512xf32>
    %41 = arith.select %39, %40, %37 : vector<4x512xi1>, vector<4x512xf32>
    %c0_11 = arith.constant 0 : index
    %c0_12 = arith.constant 0 : index
    %c0_13 = arith.constant 0 : index
    %42 = vector.load %arg4[%c0_11, %c0_12, %c0_13] : memref<9x4x4xf32, #tpu.memory_space<vmem>>, vector<1x4x4xf32>
    %43 = vector.shape_cast %42 : vector<1x4x4xf32> to vector<4x4xf32>
    %cst_14 = arith.constant dense<0.000000e+00> : vector<4x512xf32>
    %44 = tpu.matmul %43, %1, %cst_14 {dimension_numbers = #tpu.dot_dimension_numbers<[1], [0], [0], [1], [0, 0, 1, 1], [], []>} : vector<4x4xf32>, vector<4x512xf32>, vector<4x512xf32> -> vector<4x512xf32>
    %c1 = arith.constant 1 : index
    %c0_15 = arith.constant 0 : index
    %c0_16 = arith.constant 0 : index
    %45 = vector.load %arg4[%c1, %c0_15, %c0_16] : memref<9x4x4xf32, #tpu.memory_space<vmem>>, vector<1x4x4xf32>
    %46 = vector.shape_cast %45 : vector<1x4x4xf32> to vector<4x4xf32>
    %cst_17 = arith.constant dense<0.000000e+00> : vector<4x512xf32>
    %47 = tpu.matmul %46, %25, %cst_17 {dimension_numbers = #tpu.dot_dimension_numbers<[1], [0], [0], [1], [0, 0, 1, 1], [], []>} : vector<4x4xf32>, vector<4x512xf32>, vector<4x512xf32> -> vector<4x512xf32>
    %48 = arith.addf %44, %47 : vector<4x512xf32>
    %c2 = arith.constant 2 : index
    %c0_18 = arith.constant 0 : index
    %c0_19 = arith.constant 0 : index
    %49 = vector.load %arg4[%c2, %c0_18, %c0_19] : memref<9x4x4xf32, #tpu.memory_space<vmem>>, vector<1x4x4xf32>
    %50 = vector.shape_cast %49 : vector<1x4x4xf32> to vector<4x4xf32>
    %cst_20 = arith.constant dense<0.000000e+00> : vector<4x512xf32>
    %51 = tpu.matmul %50, %31, %cst_20 {dimension_numbers = #tpu.dot_dimension_numbers<[1], [0], [0], [1], [0, 0, 1, 1], [], []>} : vector<4x4xf32>, vector<4x512xf32>, vector<4x512xf32> -> vector<4x512xf32>
    %52 = arith.addf %48, %51 : vector<4x512xf32>
    %c3 = arith.constant 3 : index
    %c0_21 = arith.constant 0 : index
    %c0_22 = arith.constant 0 : index
    %53 = vector.load %arg4[%c3, %c0_21, %c0_22] : memref<9x4x4xf32, #tpu.memory_space<vmem>>, vector<1x4x4xf32>
    %54 = vector.shape_cast %53 : vector<1x4x4xf32> to vector<4x4xf32>
    %cst_23 = arith.constant dense<0.000000e+00> : vector<4x512xf32>
    %55 = tpu.matmul %54, %1, %cst_23 {dimension_numbers = #tpu.dot_dimension_numbers<[1], [0], [0], [1], [0, 0, 1, 1], [], []>} : vector<4x4xf32>, vector<4x512xf32>, vector<4x512xf32> -> vector<4x512xf32>
    %c4 = arith.constant 4 : index
    %c0_24 = arith.constant 0 : index
    %c0_25 = arith.constant 0 : index
    %56 = vector.load %arg4[%c4, %c0_24, %c0_25] : memref<9x4x4xf32, #tpu.memory_space<vmem>>, vector<1x4x4xf32>
    %57 = vector.shape_cast %56 : vector<1x4x4xf32> to vector<4x4xf32>
    %cst_26 = arith.constant dense<0.000000e+00> : vector<4x512xf32>
    %58 = tpu.matmul %57, %25, %cst_26 {dimension_numbers = #tpu.dot_dimension_numbers<[1], [0], [0], [1], [0, 0, 1, 1], [], []>} : vector<4x4xf32>, vector<4x512xf32>, vector<4x512xf32> -> vector<4x512xf32>
    %59 = arith.addf %55, %58 : vector<4x512xf32>
    %c5 = arith.constant 5 : index
    %c0_27 = arith.constant 0 : index
    %c0_28 = arith.constant 0 : index
    %60 = vector.load %arg4[%c5, %c0_27, %c0_28] : memref<9x4x4xf32, #tpu.memory_space<vmem>>, vector<1x4x4xf32>
    %61 = vector.shape_cast %60 : vector<1x4x4xf32> to vector<4x4xf32>
    %cst_29 = arith.constant dense<0.000000e+00> : vector<4x512xf32>
    %62 = tpu.matmul %61, %31, %cst_29 {dimension_numbers = #tpu.dot_dimension_numbers<[1], [0], [0], [1], [0, 0, 1, 1], [], []>} : vector<4x4xf32>, vector<4x512xf32>, vector<4x512xf32> -> vector<4x512xf32>
    %63 = arith.addf %59, %62 : vector<4x512xf32>
    %c6 = arith.constant 6 : index
    %c0_30 = arith.constant 0 : index
    %c0_31 = arith.constant 0 : index
    %64 = vector.load %arg4[%c6, %c0_30, %c0_31] : memref<9x4x4xf32, #tpu.memory_space<vmem>>, vector<1x4x4xf32>
    %65 = vector.shape_cast %64 : vector<1x4x4xf32> to vector<4x4xf32>
    %cst_32 = arith.constant dense<0.000000e+00> : vector<4x512xf32>
    %66 = tpu.matmul %65, %33, %cst_32 {dimension_numbers = #tpu.dot_dimension_numbers<[1], [0], [0], [1], [0, 0, 1, 1], [], []>} : vector<4x4xf32>, vector<4x512xf32>, vector<4x512xf32> -> vector<4x512xf32>
    %67 = arith.addf %63, %66 : vector<4x512xf32>
    %c7 = arith.constant 7 : index
    %c0_33 = arith.constant 0 : index
    %c0_34 = arith.constant 0 : index
    %68 = vector.load %arg4[%c7, %c0_33, %c0_34] : memref<9x4x4xf32, #tpu.memory_space<vmem>>, vector<1x4x4xf32>
    %69 = vector.shape_cast %68 : vector<1x4x4xf32> to vector<4x4xf32>
    %cst_35 = arith.constant dense<0.000000e+00> : vector<4x512xf32>
    %70 = tpu.matmul %69, %35, %cst_35 {dimension_numbers = #tpu.dot_dimension_numbers<[1], [0], [0], [1], [0, 0, 1, 1], [], []>} : vector<4x4xf32>, vector<4x512xf32>, vector<4x512xf32> -> vector<4x512xf32>
    %71 = arith.addf %67, %70 : vector<4x512xf32>
    %c8 = arith.constant 8 : index
    %c0_36 = arith.constant 0 : index
    %c0_37 = arith.constant 0 : index
    %72 = vector.load %arg4[%c8, %c0_36, %c0_37] : memref<9x4x4xf32, #tpu.memory_space<vmem>>, vector<1x4x4xf32>
    %73 = vector.shape_cast %72 : vector<1x4x4xf32> to vector<4x4xf32>
    %cst_38 = arith.constant dense<0.000000e+00> : vector<4x512xf32>
    %74 = tpu.matmul %73, %41, %cst_38 {dimension_numbers = #tpu.dot_dimension_numbers<[1], [0], [0], [1], [0, 0, 1, 1], [], []>} : vector<4x4xf32>, vector<4x512xf32>, vector<4x512xf32> -> vector<4x512xf32>
    %75 = arith.addf %71, %74 : vector<4x512xf32>
    %c0_39 = arith.constant 0 : index
    %c0_40 = arith.constant 0 : index
    %76 = vector.load %arg5[%c0_39, %c0_40] : memref<4x1xf32, #tpu.memory_space<vmem>>, vector<4x1xf32>
    %c0_41 = arith.constant 0 : index
    %c0_42 = arith.constant 0 : index
    %77 = memref.load %arg6[%c0_41, %c0_42] : memref<1x1xf32, #tpu.memory_space<smem>>
    %78 = vector.broadcast %76 : vector<4x1xf32> to vector<4x512xf32>
    %79 = arith.addf %52, %78 : vector<4x512xf32>
    %cst_43 = arith.constant 0.000000e+00 : f32
    %80 = vector.broadcast %cst_43 : f32 to vector<4x512xf32>
    %81 = arith.cmpf oge, %79, %80 : vector<4x512xf32>
    %82 = vector.broadcast %77 : f32 to vector<4x512xf32>
    %83 = arith.mulf %82, %79 : vector<4x512xf32>
    %84 = arith.select %81, %79, %83 : vector<4x512xi1>, vector<4x512xf32>
    %85 = vector.broadcast %76 : vector<4x1xf32> to vector<4x512xf32>
    %86 = arith.addf %75, %85 : vector<4x512xf32>
    %cst_44 = arith.constant 0.000000e+00 : f32
    %87 = vector.broadcast %cst_44 : f32 to vector<4x512xf32>
    %88 = arith.cmpf oge, %86, %87 : vector<4x512xf32>
    %89 = vector.broadcast %77 : f32 to vector<4x512xf32>
    %90 = arith.mulf %89, %86 : vector<4x512xf32>
    %91 = arith.select %88, %86, %90 : vector<4x512xi1>, vector<4x512xf32>
    %92 = vector.extract_strided_slice %84 {offsets = [0, 0], sizes = [4, 32], strides = [1, 1]} : vector<4x512xf32> to vector<4x32xf32>
    %93 = vector.extract_strided_slice %91 {offsets = [0, 0], sizes = [4, 32], strides = [1, 1]} : vector<4x512xf32> to vector<4x32xf32>
    %94 = vector.extract_strided_slice %84 {offsets = [0, 32], sizes = [4, 32], strides = [1, 1]} : vector<4x512xf32> to vector<4x32xf32>
    %95 = vector.extract_strided_slice %91 {offsets = [0, 32], sizes = [4, 32], strides = [1, 1]} : vector<4x512xf32> to vector<4x32xf32>
    %96 = vector.extract_strided_slice %84 {offsets = [0, 64], sizes = [4, 32], strides = [1, 1]} : vector<4x512xf32> to vector<4x32xf32>
    %97 = vector.extract_strided_slice %91 {offsets = [0, 64], sizes = [4, 32], strides = [1, 1]} : vector<4x512xf32> to vector<4x32xf32>
    %98 = vector.extract_strided_slice %84 {offsets = [0, 96], sizes = [4, 32], strides = [1, 1]} : vector<4x512xf32> to vector<4x32xf32>
    %99 = vector.extract_strided_slice %91 {offsets = [0, 96], sizes = [4, 32], strides = [1, 1]} : vector<4x512xf32> to vector<4x32xf32>
    %100 = vector.extract_strided_slice %84 {offsets = [0, 128], sizes = [4, 32], strides = [1, 1]} : vector<4x512xf32> to vector<4x32xf32>
    %101 = vector.extract_strided_slice %91 {offsets = [0, 128], sizes = [4, 32], strides = [1, 1]} : vector<4x512xf32> to vector<4x32xf32>
    %102 = vector.extract_strided_slice %84 {offsets = [0, 160], sizes = [4, 32], strides = [1, 1]} : vector<4x512xf32> to vector<4x32xf32>
    %103 = vector.extract_strided_slice %91 {offsets = [0, 160], sizes = [4, 32], strides = [1, 1]} : vector<4x512xf32> to vector<4x32xf32>
    %104 = vector.extract_strided_slice %84 {offsets = [0, 192], sizes = [4, 32], strides = [1, 1]} : vector<4x512xf32> to vector<4x32xf32>
    %105 = vector.extract_strided_slice %91 {offsets = [0, 192], sizes = [4, 32], strides = [1, 1]} : vector<4x512xf32> to vector<4x32xf32>
    %106 = vector.extract_strided_slice %84 {offsets = [0, 224], sizes = [4, 32], strides = [1, 1]} : vector<4x512xf32> to vector<4x32xf32>
    %107 = vector.extract_strided_slice %91 {offsets = [0, 224], sizes = [4, 32], strides = [1, 1]} : vector<4x512xf32> to vector<4x32xf32>
    %108 = vector.extract_strided_slice %84 {offsets = [0, 256], sizes = [4, 32], strides = [1, 1]} : vector<4x512xf32> to vector<4x32xf32>
    %109 = vector.extract_strided_slice %91 {offsets = [0, 256], sizes = [4, 32], strides = [1, 1]} : vector<4x512xf32> to vector<4x32xf32>
    %110 = vector.extract_strided_slice %84 {offsets = [0, 288], sizes = [4, 32], strides = [1, 1]} : vector<4x512xf32> to vector<4x32xf32>
    %111 = vector.extract_strided_slice %91 {offsets = [0, 288], sizes = [4, 32], strides = [1, 1]} : vector<4x512xf32> to vector<4x32xf32>
    %112 = vector.extract_strided_slice %84 {offsets = [0, 320], sizes = [4, 32], strides = [1, 1]} : vector<4x512xf32> to vector<4x32xf32>
    %113 = vector.extract_strided_slice %91 {offsets = [0, 320], sizes = [4, 32], strides = [1, 1]} : vector<4x512xf32> to vector<4x32xf32>
    %114 = vector.extract_strided_slice %84 {offsets = [0, 352], sizes = [4, 32], strides = [1, 1]} : vector<4x512xf32> to vector<4x32xf32>
    %115 = vector.extract_strided_slice %91 {offsets = [0, 352], sizes = [4, 32], strides = [1, 1]} : vector<4x512xf32> to vector<4x32xf32>
    %116 = vector.extract_strided_slice %84 {offsets = [0, 384], sizes = [4, 32], strides = [1, 1]} : vector<4x512xf32> to vector<4x32xf32>
    %117 = vector.extract_strided_slice %91 {offsets = [0, 384], sizes = [4, 32], strides = [1, 1]} : vector<4x512xf32> to vector<4x32xf32>
    %118 = vector.extract_strided_slice %84 {offsets = [0, 416], sizes = [4, 32], strides = [1, 1]} : vector<4x512xf32> to vector<4x32xf32>
    %119 = vector.extract_strided_slice %91 {offsets = [0, 416], sizes = [4, 32], strides = [1, 1]} : vector<4x512xf32> to vector<4x32xf32>
    %120 = vector.extract_strided_slice %84 {offsets = [0, 448], sizes = [4, 32], strides = [1, 1]} : vector<4x512xf32> to vector<4x32xf32>
    %121 = vector.extract_strided_slice %91 {offsets = [0, 448], sizes = [4, 32], strides = [1, 1]} : vector<4x512xf32> to vector<4x32xf32>
    %122 = vector.extract_strided_slice %84 {offsets = [0, 480], sizes = [4, 32], strides = [1, 1]} : vector<4x512xf32> to vector<4x32xf32>
    %123 = vector.extract_strided_slice %91 {offsets = [0, 480], sizes = [4, 32], strides = [1, 1]} : vector<4x512xf32> to vector<4x32xf32>
    %124 = tpu.concatenate %92, %93, %94, %95, %96, %97, %98, %99, %100, %101, %102, %103, %104, %105, %106, %107 in 1 : vector<4x32xf32>, vector<4x32xf32>, vector<4x32xf32>, vector<4x32xf32>, vector<4x32xf32>, vector<4x32xf32>, vector<4x32xf32>, vector<4x32xf32>, vector<4x32xf32>, vector<4x32xf32>, vector<4x32xf32>, vector<4x32xf32>, vector<4x32xf32>, vector<4x32xf32>, vector<4x32xf32>, vector<4x32xf32> -> vector<4x512xf32>
    %125 = tpu.concatenate %108, %109, %110, %111, %112, %113, %114, %115, %116, %117, %118, %119, %120, %121, %122, %123 in 1 : vector<4x32xf32>, vector<4x32xf32>, vector<4x32xf32>, vector<4x32xf32>, vector<4x32xf32>, vector<4x32xf32>, vector<4x32xf32>, vector<4x32xf32>, vector<4x32xf32>, vector<4x32xf32>, vector<4x32xf32>, vector<4x32xf32>, vector<4x32xf32>, vector<4x32xf32>, vector<4x32xf32>, vector<4x32xf32> -> vector<4x512xf32>
    %126 = tpu.concatenate %124, %125 in 1 : vector<4x512xf32>, vector<4x512xf32> -> vector<4x1024xf32>
    %c0_45 = arith.constant 0 : index
    %c0_46 = arith.constant 0 : index
    %c0_47 = arith.constant 0 : index
    %127 = vector.load %arg7[%c0_45, %c0_46, %c0_47] : memref<1x4x1024xf32, #tpu.memory_space<vmem>>, vector<1x4x1024xf32>
    %128 = vector.shape_cast %127 : vector<1x4x1024xf32> to vector<4x1024xf32>
    %129 = vector.shape_cast %126 : vector<4x1024xf32> to vector<1x4x1024xf32>
    tpu.vector_store %arg7[%c0_45, %c0_46, %c0_47], %129 {strides = array<i32>} : memref<1x4x1024xf32, #tpu.memory_space<vmem>>, vector<1x4x1024xf32>,
    return
  }
  func.func @transform_0(%arg0: i32, %arg1: i32) -> (i32, i32, i32) {
    %c0_i32 = arith.constant 0 : i32
    %c0_i32_0 = arith.constant 0 : i32
    return %arg0, %c0_i32, %arg1 : i32, i32, i32
  }
  func.func @transform_1(%arg0: i32, %arg1: i32) -> (i32, i32, i32, i32) {
    %c0_i32 = arith.constant 0 : i32
    %c0_i32_0 = arith.constant 0 : i32
    %c0_i32_1 = arith.constant 0 : i32
    return %arg0, %arg1, %c0_i32, %c0_i32_0 : i32, i32, i32, i32
  }
  func.func @transform_2(%arg0: i32, %arg1: i32) -> (i32, i32, i32) {
    %c0_i32 = arith.constant 0 : i32
    %c0_i32_0 = arith.constant 0 : i32
    %c0_i32_1 = arith.constant 0 : i32
    %c0_i32_2 = arith.constant 0 : i32
    return %c0_i32, %c0_i32_0, %c0_i32_1 : i32, i32, i32
  }
  func.func @transform_3(%arg0: i32, %arg1: i32) -> (i32, i32) {
    %c0_i32 = arith.constant 0 : i32
    %c0_i32_0 = arith.constant 0 : i32
    %c0_i32_1 = arith.constant 0 : i32
    return %c0_i32, %c0_i32_0 : i32, i32
  }
  func.func @transform_4(%arg0: i32, %arg1: i32) -> (i32, i32) {
    %c0_i32 = arith.constant 0 : i32
    %c0_i32_0 = arith.constant 0 : i32
    %c0_i32_1 = arith.constant 0 : i32
    return %c0_i32, %c0_i32_0 : i32, i32
  }
  func.func @transform_5(%arg0: i32, %arg1: i32) -> (i32, i32, i32) {
    %c0_i32 = arith.constant 0 : i32
    %c0_i32_0 = arith.constant 0 : i32
    return %arg0, %c0_i32, %arg1 : i32, i32, i32
  }
}

</mosaic_0001>

<bundles_post_ra>
// kernel: tpu_custom_call.1
= control target key start
LH: loop header
LB: loop body
LE: loop exit
PB: predicated region body
PF: predicated region fallthrough
CT: control target
= control target key end

     0   :  { %s2804_s0 = inlined_call_operand.vmem [shape: f32[2,4,512], index: 0, kind: input, shape index: {}]   ;;  %s2805_s1 = inlined_call_operand.vmem [shape: f32[2,1,4,32], index: 1, kind: input, shape index: {}]   ;;  %s2806_s2 = inlined_call_operand.vmem [shape: f32[9,4,4], index: 2, kind: input, shape index: {}]   ;;  %s2807_s3 = inlined_call_operand.vmem [shape: f32[4,1], index: 3, kind: input, shape index: {}]   ;;  %s2808_s4 = inlined_call_operand.<no memory space> [shape: f32[1,1], index: 4, kind: input, shape index: {}]   ;;  %s2809_s5 = inlined_call_operand.hbm [shape: f32[2,4,1024], index: 5, kind: output, shape index: {}]  }
   0x1   :  { %10 = sst [smem:[#allocation2]] %s2808_s4 }
   0x2   :  { %11 = vsyncpa [#allocation4], 0 }
   0x3   :  { %13 = vsyncpa [#allocation4 + $0x1], 0  ;;  %s2381_s20 = smov 0   ;;  %s2383_s21 = smov 0  }
   0x4   :  { %s2385_s22 = smov 0   ;;  %s2387_s23 = smov 0  }
   0x5   :  { %s2389_s24 = smov 0   ;;  %s2391_s25 = smov 0  }
   0x6 LB: > { %s2118_s4 = sadd.s32 4294967295, %s2338_s25   ;;  %s2119_s26 = sadd.s32 4294967294, %s2338_s25   ;;  %s2338_s25 = sphi %s2391_s25, %s19_s25   ;;  %s2334_s24 = sphi %s2389_s24, %s2824_s24   ;;  %s2330_s23 = sphi %s2387_s23, %s2823_s23   ;;  %s2326_s22 = sphi %s2385_s22, %s2822_s22   ;;  %s2322_s21 = sphi %s2383_s21, %s2821_s21   ;;  %s2318_s20 = sphi %s2381_s20, %s2820_s20  }
   0x7   : > { %s31_s27 = sadd.s32 1, %s2334_s24  ;;  %s159_s28 = sadd.s32 1, %s2326_s22 }
   0x8   : > { %p33_p0 = scmp.ge.s32.totalorder %s31_s27, 2  ;;  %p169_p1 = scmp.ne.s32.totalorder %s2326_s22, %s2322_s21 }
   0x9   : > { %p170_p2 = scmp.eq.s32.totalorder %s2118_s4, 1  ;;  %p175_p3 = scmp.ne.s32.totalorder %s2322_s21, %s2318_s20 }
   0xa   : > { %s2826_s27 = smov (%p33_p0, %s31_s27), 0  ;;  %p176_p5 = scmp.eq.s32.totalorder %s2119_s26, 1 }
   0xb   : > { %p2421_p4 = por %p170_p2, %p169_p1  ;;  %s154_s30 = ssub.s32 %s2334_s24, %s2826_s27 }
   0xc   : > { %p2122_p6 = scmp.ge.s32.totalorder %s2338_s25, 1  ;;  %p157_p7 = scmp.eq.s32.totalorder %s154_s30, 0 }
   0xd   : > { %p2428_p8 = por %p176_p5, %p175_p3  ;;  %p226_p9 = scmp.lt.s32.totalorder %s2338_s25, 3 }
   0xe   : > { %s2434_s7 = scalar_select %p157_p7, %s2326_s22, %s159_s28  }
   0xf   : > { %p227_p10 = pnand %p2122_p6, %p226_p9 }
  0x10   : > { %p266_p11 = scmp.lt.s32.totalorder (!%p227_p10), %s2330_s23, 1  ;;  %s2340_s14 = smov (!%p227_p10), 96  }
  0x11   : > { %230 = sbr.rel (%p227_p10) target bundleno = 630 (0x276), region = 40  ;;  %s2342_s18 = smov (!%p227_p10), 1  }
  0x12   : > { %s2343_s19 = smov (!%p227_p10), 127   ;;  %s2345_s10 = smov (!%p227_p10), 32  }
  0x13   : > { %s2346_s11 = smov (!%p227_p10), 64   ;;  %s2195_s15 = sshll.u32 (!%p227_p10), %s2330_s23, 9 }
  0x14   : > { %s2347_s26 = smov (!%p227_p10), [#allocation3]  }
  0x15   : > { %s2266_s28 = sshll.u32 (!%p227_p10), %s2347_s26, 4  ;;  %s2267_s28 = int_to_ptr.vmem [resolvable:$false] %s2266_s28 }
  0x16   : > { %s267_s8 = scalar_select %p266_p11, %s2330_s23, 1  ;;  %v2341_v5 = vmov 0.0   ;;  %vm398_vm0 = vcmask 785408   ;;  %v286_v8 = vlaneseq  ;;  %vm355_vm1 = vcmask 7168   ;;  %v2127_v26 = vld [vmem:[%s2806_s2 + $0x4] sm:$0xf] }
  0x17   : > { %523 = vmatprep.mubr.f32.mxu0 %v2341_v5  ;;  %594 = vmatprep.mubr.f32.mxu1 %v2341_v5  ;;  %v2344_v20 = vmov 0   ;;  %vm449_vm2 = vcmask 1043456   ;;  %vm445_vm3 = vcmask 31744   ;;  %vm369_vm4 = vcmask 1039360   ;;  %v442_v40 = vld [vmem:[%s2806_s2] sm:$0xf] }
  0x18   : > { %s2194_s9 = sshll.u32 %s267_s8, 4  ;;  %s2126_s13 = sshll.u32 %s267_s8, 2  ;;  %v287_v13 = vand.u32 127, %v286_v8  ;;  %2258 = vset.pattern.permute.xlu1 %v2344_v20  ;;  %2259 = vset.pattern.permute.xlu0 %v2344_v20  ;;  %v1844_v46 = vld [vmem:[%s2807_s3] sm:$0xf] }
  0x19   : > { %s273_s12 = scalar_lea.vmem %s2804_s0, %s2194_s9  ;;  %s281_s17 = scalar_lea.vmem %s2805_s1, %s2126_s13  ;;  %v2140_v51 = vld [vmem:[%s2806_s2 + $0x8] sm:$0xf]  ;;  %v2148_v53 = vld [vmem:[%s2806_s2 + $0x10] sm:$0xf]  ;;  %v2147_v54 = vld [vmem:[%s2806_s2 + $0xc] sm:$0xf] }
  0x1a   : > { %v2441_v0 = vld [vmem:[%s273_s12 + $0x8] sm:$0xff]  ;;  %v2443_v1 = vld [vmem:[%s273_s12] sm:$0xff]  ;;  %v288_v18 = vadd.s32 128, %v287_v13  ;;  %v290_v19 = vadd.s32 384, %v287_v13  ;;  %v289_v23 = vadd.s32 256, %v287_v13  ;;  %v295_v36 = vand.u32 31, %v287_v13 }
  0x1b   : > { %394 = vrot.lane.b32.xlu1 %v2441_v0, %s2340_s14  ;;  %390 = vrot.lane.b32.xlu0 %v2443_v1, %s2340_s14  ;;  %v2451_v2 = vcombine.high %v2441_v0, %v2441_v0  ;;  %v2455_v3 = vcombine.high %v2443_v1, %v2443_v1  ;;  %v285_v4 = vld [vmem:[%s281_s17] sm:$0xf]  ;;  %v2161_v55 = vld [vmem:[%s2806_s2 + $0x14] sm:$0xf]  ;;  %s1845_s9 = sld [smem:[#allocation2]]  ;;  %s2268_s30 = scalar_lea.vmem %s2267_s28, 1024 }
  0x1c   : > { %v302_v27 = vand.u32 31, %v288_v18  ;;  %v316_v28 = vand.u32 31, %v290_v19  ;;  %v309_v31 = vand.u32 31, %v289_v23  ;;  %vm2554_vm8 = vcmp.eq.s32.totalorder %v295_v36, 31  ;;  %v2168_v56 = vld [vmem:[%s2806_s2 + $0x18] sm:$0xf] }
  0x1d   : > { %v2175_v61 = vld [vmem:[%s2806_s2 + $0x1c] sm:$0xf] }
  0x1e   : > { %vm2516_vm5 = vcmp.eq.s32.totalorder %v302_v27, 31  ;;  %vm2520_vm6 = vcmp.eq.s32.totalorder %v316_v28, 31  ;;  %vm2527_vm7 = vcmp.eq.s32.totalorder %v309_v31, 31 }
  0x1f   : > { %396 = vrot.lane.b32.xlu1 %v2451_v2, %s2340_s14  ;;  %392 = vrot.lane.b32.xlu0 %v2455_v3, %s2340_s14 }
  0x23   : > { %404 = vrot.lane.b32.xlu0 %v285_v4, %s2340_s14  ;;  %347 = vrot.lane.b32.xlu1 %v2443_v1, %s2342_s18 }
  0x27   : > { %349 = vrot.lane.b32.xlu0 %v2455_v3, %s2342_s18  ;;  %351 = vrot.lane.b32.xlu1 %v2441_v0, %s2342_s18 }
  0x2b   : > { %353 = vrot.lane.b32.xlu0 %v2451_v2, %s2342_s18  ;;  %363 = vrot.lane.b32.xlu1 %v2455_v3, %s2343_s19 }
  0x2f   : > { %365 = vrot.lane.b32.xlu0 %v2441_v0, %s2343_s19  ;;  %367 = vrot.lane.b32.xlu1 %v2451_v2, %s2343_s19 }
  0x33   : > { %361 = vrot.lane.b32.xlu0 %v2443_v1, %s2343_s19 }
  0x8d   : > { %v395_v6 = vpop.permute.xlu1 %394  ;;  %v391_v7 = vpop.permute.xlu0 %390 }
  0x91   : > { %v397_v9 = vpop.permute.xlu1 %396  ;;  %v393_v10 = vpop.permute.xlu0 %392 }
  0x92   : > { %v2480_v11 = vsel %vm398_vm0, %v393_v10, %v395_v6  ;;  %v2483_v12 = vsel %vm398_vm0, %v391_v7, %v393_v10  ;;  %v2488_v16 = vsel %vm398_vm0, %v395_v6, %v397_v9 }
  0x93   : > { %411 = vrot.lane.b32.xlu0 %v2480_v11, %s2342_s18  ;;  %409 = vrot.lane.b32.xlu1 %v2483_v12, %s2342_s18 }
  0x95   : > { %v405_v14 = vpop.permute.xlu0 %404  ;;  %v348_v15 = vpop.permute.xlu1 %347 }
  0x96   : > { %v2491_v17 = vsel %vm398_vm0, %v397_v9, %v405_v14  ;;  %v360_v25 = vsel %vm355_vm1, 0.0, %v348_v15 }
  0x97   : > { %413 = vrot.lane.b32.xlu1 %v2488_v16, %s2342_s18  ;;  %415 = vrot.lane.b32.xlu0 %v2491_v17, %s2342_s18 }
  0x99   : > { %v350_v21 = vpop.permute.xlu0 %349  ;;  %v352_v22 = vpop.permute.xlu1 %351 }
  0x9a   : > { %v356_v24 = vsel %vm355_vm1, %v348_v15, %v350_v21  ;;  %v357_v33 = vsel %vm355_vm1, %v350_v21, %v352_v22 }
  0x9b   : > { %424 = vrot.lane.b32.xlu1 %v2480_v11, %s2343_s19  ;;  %426 = vrot.lane.b32.xlu0 %v2488_v16, %s2343_s19 }
  0x9c   : > { %2128 = vmatprep.subr.msk.mxu0 %vm449_vm2, %v356_v24 }
  0x9d   : > { %v354_v29 = vpop.permute.xlu0 %353  ;;  %v364_v30 = vpop.permute.xlu1 %363  ;;  %2129 = vmatpush1.msk.msra.mxu0 %vm449_vm2, %v360_v25 }
  0x9e   : > { %v358_v32 = vsel %vm355_vm1, %v352_v22, %v354_v29  ;;  %2130 = vmatmul.mubr.msk.f32.vlgmr.msra.gmra.mxu0 %vm445_vm3, %v2127_v26  ;;  %2134 = vmatprep.subr.msk.mxu0 %vm449_vm2, %v2455_v3 }
  0x9f   : > { %428 = vrot.lane.b32.xlu1 %v2491_v17, %s2343_s19  ;;  %422 = vrot.lane.b32.xlu0 %v2483_v12, %s2343_s19  ;;  %s2025_s19 = scalar_lea.hbm %s2809_s5, %s2195_s15 }
  0xa0   : > { %2131 = vmatprep.subr.msk.mxu1 %vm449_vm2, %v358_v32  ;;  %2135 = vmatpush1.msk.msra.mxu0 %vm449_vm2, %v2443_v1 }
  0xa1   : > { %2132 = vmatpush1.msk.msra.mxu1 %vm449_vm2, %v357_v33  ;;  %v366_v37 = vpop.permute.xlu0 %365  ;;  %v368_v39 = vpop.permute.xlu1 %367  ;;  %676 = vmatprep.mubr.f32.mxu0 %v2341_v5 }
  0xa2   : > { %2133 = vmatmul.mubr.msk.f32.vlgmr.msra.gmra.mxu1 %vm445_vm3, %v2127_v26  ;;  %v371_v41 = vsel %vm369_vm4, %v364_v30, %v366_v37  ;;  %2137 = vmatprep.subr.msk.mxu1 %vm449_vm2, %v2451_v2  ;;  %v372_v42 = vsel %vm369_vm4, %v366_v37, %v368_v39  ;;  %v377_v43 = vsel %vm369_vm4, %v368_v39, 0.0 }
  0xa3   : > { %v387_v44 = vsel %vm2516_vm5, 0.0, %v371_v41  ;;  %v389_v45 = vsel %vm2520_vm6, 0.0, %v377_v43  ;;  %2138 = vmatpush1.msk.msra.mxu1 %vm449_vm2, %v2441_v0  ;;  %747 = vmatprep.mubr.f32.mxu1 %v2341_v5  ;;  %v388_v47 = vsel %vm2527_vm7, 0.0, %v372_v42 }
  0xa4   : > { %2136 = vmatmul.mubr.msk.f32.vlgmr.msra.gmra.mxu0 %vm445_vm3, %v442_v40  ;;  %2141 = vmatprep.subr.msk.mxu0 %vm449_vm2, %v387_v44 }
  0xa5   : > { %v362_v49 = vpop.permute.xlu0 %361  ;;  %2144 = vmatprep.subr.msk.mxu1 %vm449_vm2, %v389_v45  ;;  %835 = vmatprep.mubr.f32.mxu0 %v2341_v5 }
  0xa6   : > { %2139 = vmatmul.mubr.msk.f32.vlgmr.msra.gmra.mxu1 %vm445_vm3, %v442_v40  ;;  %v370_v50 = vsel %vm369_vm4, %v362_v49, %v364_v30  ;;  %1848 = vperm.xlu1 %2258, %v1844_v46  }
  0xa7   : > { %v386_v52 = vsel %vm2554_vm8, 0.0, %v370_v50  ;;  %2145 = vmatpush1.msk.msra.mxu1 %vm449_vm2, %v388_v47  ;;  %906 = vmatprep.mubr.f32.mxu1 %v2341_v5 }
  0xa8   : > { %2142 = vmatpush1.msk.msra.mxu0 %vm449_vm2, %v386_v52  ;;  %2152 = vmatprep.subr.msk.mxu1 %vm449_vm2, %v358_v32  ;;  %v2665_v32 = vstv %s1845_s9 }
  0xa9   : > { %2143 = vmatmul.mubr.msk.f32.vlgmr.msra.gmra.mxu0 %vm445_vm3, %v2140_v51  ;;  %2149 = vmatprep.subr.msk.mxu0 %vm449_vm2, %v356_v24 }
  0xaa   : > { %2146 = vmatmul.mubr.msk.f32.vlgmr.msra.gmra.mxu1 %vm445_vm3, %v2140_v51  ;;  %2150 = vmatpush1.msk.msra.mxu0 %vm449_vm2, %v360_v25 }
  0xab   : > { %988 = vmatprep.mubr.f32.mxu0 %v2341_v5  ;;  %2153 = vmatpush1.msk.msra.mxu1 %vm449_vm2, %v357_v33 }
  0xac   : > { %1059 = vmatprep.mubr.f32.mxu1 %v2341_v5  ;;  %2155 = vmatprep.subr.msk.mxu0 %vm449_vm2, %v2455_v3 }
  0xad   : > { %2151 = vmatmul.mubr.msk.f32.vlgmr.msra.gmra.mxu0 %vm445_vm3, %v2148_v53  ;;  %2158 = vmatprep.subr.msk.mxu1 %vm449_vm2, %v2451_v2 }
  0xae   : > { %2154 = vmatmul.mubr.msk.f32.vlgmr.msra.gmra.mxu1 %vm445_vm3, %v2148_v53  ;;  %2156 = vmatpush1.msk.msra.mxu0 %vm449_vm2, %v2443_v1 }
  0xaf   : > { %2159 = vmatpush1.msk.msra.mxu1 %vm449_vm2, %v2441_v0  ;;  %1133 = vmatprep.mubr.f32.mxu0 %v2341_v5 }
  0xb0   : > { %1204 = vmatprep.mubr.f32.mxu1 %v2341_v5  ;;  %2162 = vmatprep.subr.msk.mxu0 %vm449_vm2, %v387_v44 }
  0xb1   : > { %2165 = vmatprep.subr.msk.mxu1 %vm449_vm2, %v389_v45  ;;  %2157 = vmatmul.mubr.msk.f32.vlgmr.msra.gmra.mxu0 %vm445_vm3, %v2147_v54 }
  0xb2   : > { %2160 = vmatmul.mubr.msk.f32.vlgmr.msra.gmra.mxu1 %vm445_vm3, %v2147_v54  ;;  %2163 = vmatpush1.msk.msra.mxu0 %vm449_vm2, %v386_v52 }
  0xb3   : > { %2166 = vmatpush1.msk.msra.mxu1 %vm449_vm2, %v388_v47  ;;  %2169 = vmatprep.subr.msk.mxu0 %vm449_vm2, %v2480_v11 }
  0xb4   : > { %2172 = vmatprep.subr.msk.mxu1 %vm449_vm2, %v2491_v17  ;;  %1280 = vmatprep.mubr.f32.mxu0 %v2341_v5 }
  0xb5   : > { %1351 = vmatprep.mubr.f32.mxu1 %v2341_v5  ;;  %2164 = vmatmul.mubr.msk.f32.vlgmr.msra.gmra.mxu0 %vm445_vm3, %v2161_v55 }
  0xb6   : > { %2167 = vmatmul.mubr.msk.f32.vlgmr.msra.gmra.mxu1 %vm445_vm3, %v2161_v55  ;;  %2170 = vmatpush1.msk.msra.mxu0 %vm449_vm2, %v2483_v12  ;;  %v2182_v12 = vld [vmem:[%s2806_s2 + $0x20] sm:$0xf] }
  0xb7   : > { %2173 = vmatpush1.msk.msra.mxu1 %vm449_vm2, %v2488_v16  ;;  %1439 = vmatprep.mubr.f32.mxu0 %v2341_v5 }
  0xb8   : > { %1510 = vmatprep.mubr.f32.mxu1 %v2341_v5 }
  0xb9   : > { %2171 = vmatmul.mubr.msk.f32.vlgmr.msra.gmra.mxu0 %vm445_vm3, %v2168_v56 }
  0xba   : > { %1599 = vmatprep.mubr.f32.mxu0 %v2341_v5  ;;  %2174 = vmatmul.mubr.msk.f32.vlgmr.msra.gmra.mxu1 %vm445_vm3, %v2168_v56 }
  0xbb   : > { %1670 = vmatprep.mubr.f32.mxu1 %v2341_v5 }
 0x105   : > { %v410_v57 = vpop.permute.xlu1 %409  ;;  %v412_v58 = vpop.permute.xlu0 %411 }
 0x106   : > { %v421_v59 = vsel %vm355_vm1, 0.0, %v410_v57  ;;  %v417_v60 = vsel %vm355_vm1, %v410_v57, %v412_v58 }
 0x107   : > { %2176 = vmatprep.subr.msk.mxu0 %vm449_vm2, %v417_v60 }
 0x108   : > { %2177 = vmatpush1.msk.msra.mxu0 %vm449_vm2, %v421_v59 }
 0x109   : > { %v414_v62 = vpop.permute.xlu1 %413  ;;  %2178 = vmatmul.mubr.msk.f32.vlgmr.msra.gmra.mxu0 %vm445_vm3, %v2175_v61  ;;  %v416_v63 = vpop.permute.xlu0 %415 }
 0x10a   : > { %v418_v0 = vsel %vm355_vm1, %v412_v58, %v414_v62  ;;  %v419_v1 = vsel %vm355_vm1, %v414_v62, %v416_v63  ;;  %1762 = vmatprep.mubr.f32.mxu0 %v2341_v5 }
 0x10b   : > { %2179 = vmatprep.subr.msk.mxu1 %vm449_vm2, %v419_v1 }
 0x10c   : > { %2180 = vmatpush1.msk.msra.mxu1 %vm449_vm2, %v418_v0 }
 0x10d   : > { %v425_v2 = vpop.permute.xlu1 %424  ;;  %v427_v3 = vpop.permute.xlu0 %426  ;;  %2181 = vmatmul.mubr.msk.f32.vlgmr.msra.gmra.mxu1 %vm445_vm3, %v2175_v61 }
 0x10e   : > { %v431_v4 = vsel %vm369_vm4, %v425_v2, %v427_v3  ;;  %1833 = vmatprep.mubr.f32.mxu1 %v2341_v5 }
 0x10f   : > { %v439_v6 = vsel %vm2516_vm5, 0.0, %v431_v4 }
 0x110   : > { %2183 = vmatprep.subr.msk.mxu0 %vm449_vm2, %v439_v6 }
 0x111   : > { %v429_v7 = vpop.permute.xlu1 %428  ;;  %v423_v8 = vpop.permute.xlu0 %422 }
 0x112   : > { %v432_v9 = vsel %vm369_vm4, %v427_v3, %v429_v7  ;;  %v437_v10 = vsel %vm369_vm4, %v429_v7, 0.0  ;;  %v430_v11 = vsel %vm369_vm4, %v423_v8, %v425_v2 }
 0x113   : > { %v440_v5 = vsel %vm2527_vm7, 0.0, %v432_v9  ;;  %v441_v13 = vsel %vm2520_vm6, 0.0, %v437_v10  ;;  %v438_v14 = vsel %vm2554_vm8, 0.0, %v430_v11 }
 0x114   : > { %2184 = vmatpush1.msk.msra.mxu0 %vm449_vm2, %v438_v14  ;;  %2186 = vmatprep.subr.msk.mxu1 %vm449_vm2, %v441_v13 }
 0x115   : > { %2185 = vmatmul.mubr.msk.f32.vlgmr.msra.gmra.mxu0 %vm445_vm3, %v2182_v12  ;;  %2187 = vmatpush1.msk.msra.mxu1 %vm449_vm2, %v440_v5  ;;  %vm1924_vm2 = vcmask 261120  }
 0x116   : > { %2188 = vmatmul.mubr.msk.f32.vlgmr.msra.gmra.mxu1 %vm445_vm3, %v2182_v12  ;;  %vm1926_vm3 = vcmask 523264  }
 0x121   : > { %v2663_v27 = vpop.permute.xlu1 %1848 }
 0x15e   : > { %v525_v15 = vpop.f32.mrf.mxu0 }
 0x160   : > { %v527_v16 = vpop.f32.mrf.mxu0 }
 0x162   : > { %v596_v17 = vpop.f32.mrf.mxu1 }
 0x164   : > { %v678_v18 = vpop.f32.mrf.mxu0  ;;  %v598_v19 = vpop.f32.mrf.mxu1 }
 0x165   : > { %v679_v20 = vadd.f32 %v678_v18, %v525_v15 }
 0x166   : > { %v680_v21 = vpop.f32.mrf.mxu0  ;;  %v749_v22 = vpop.f32.mrf.mxu1 }
 0x167   : > { %v750_v23 = vadd.f32 %v749_v22, %v596_v17  ;;  %v681_v24 = vadd.f32 %v680_v21, %v527_v16 }
 0x168   : > { %v751_v25 = vpop.f32.mrf.mxu1 }
 0x169   : > { %v837_v26 = vpop.f32.mrf.mxu0  ;;  %v752_v29 = vadd.f32 %v751_v25, %v598_v19 }
 0x16a   : > { %v913_v28 = vadd.f32 %v837_v26, %v679_v20  ;;  %v908_v30 = vpop.f32.mrf.mxu1 }
 0x16b   : > { %v915_v31 = vadd.f32 %v908_v30, %v750_v23  ;;  %v839_v33 = vpop.f32.mrf.mxu0 }
 0x16c   : > { %v1851_v34 = vadd.f32 %v2663_v27, %v913_v28  ;;  %v914_v35 = vadd.f32 %v839_v33, %v681_v24  ;;  %v910_v36 = vpop.f32.mrf.mxu1 }
 0x16d   : > { %v1853_v37 = vadd.f32 %v2663_v27, %v915_v31  ;;  %v916_v40 = vadd.f32 %v910_v36, %v752_v29  ;;  %v990_v50 = vpop.f32.mrf.mxu0 }
 0x16e   : > { %vm1855_vm9 = vcmp.ge.f32.partialorder %v1851_v34, 0.0  ;;  %v1860_v38 = vmul.f32 %v2665_v32, %v1851_v34  ;;  %v1852_v39 = vadd.f32 %v2663_v27, %v914_v35  ;;  %v1061_v49 = vpop.f32.mrf.mxu1 }
 0x16f   : > { %v1862_v41 = vmul.f32 %v2665_v32, %v1853_v37  ;;  %vm1857_vm10 = vcmp.ge.f32.partialorder %v1853_v37, 0.0  ;;  %v1854_v44 = vadd.f32 %v2663_v27, %v916_v40  ;;  %v992_v52 = vpop.f32.mrf.mxu0 }
 0x170   : > { %v2672_v42 = vsel %vm1855_vm9, %v1851_v34, %v1860_v38  ;;  %v1861_v43 = vmul.f32 %v2665_v32, %v1852_v39  ;;  %vm1856_vm11 = vcmp.ge.f32.partialorder %v1852_v39, 0.0  ;;  %v1063_v51 = vpop.f32.mrf.mxu1 }
 0x171   : > { %1889 = vrot.lane.b32.xlu0 %v2672_v42, %s2345_s10  ;;  %1895 = vrot.lane.b32.xlu1 %v2672_v42, %s2346_s11  ;;  %v2680_v45 = vsel %vm1857_vm10, %v1853_v37, %v1862_v41  ;;  %v1863_v46 = vmul.f32 %v2665_v32, %v1854_v44  ;;  %vm1858_vm12 = vcmp.ge.f32.partialorder %v1854_v44, 0.0  ;;  %v1135_v54 = vpop.f32.mrf.mxu0 }
 0x172   : > { %v2687_v47 = vsel %vm1856_vm11, %v1852_v39, %v1861_v43  ;;  %v1206_v53 = vpop.f32.mrf.mxu1  ;;  %v1136_v63 = vadd.f32 %v1135_v54, %v990_v50 }
 0x173   : > { %v2693_v48 = vsel %vm1858_vm12, %v1854_v44, %v1863_v46  ;;  %v1137_v56 = vpop.f32.mrf.mxu0  ;;  %v1207_v0 = vadd.f32 %v1206_v53, %v1061_v49 }
 0x174   : > { %v1208_v55 = vpop.f32.mrf.mxu1  ;;  %v1138_v1 = vadd.f32 %v1137_v56, %v992_v52 }
 0x175   : > { %1943 = vrot.lane.b32.xlu0 %v2680_v45, %s2345_s10  ;;  %1949 = vrot.lane.b32.xlu1 %v2680_v45, %s2346_s11  ;;  %v1282_v58 = vpop.f32.mrf.mxu0  ;;  %v1209_v2 = vadd.f32 %v1208_v55, %v1063_v51 }
 0x176   : > { %v1353_v57 = vpop.f32.mrf.mxu1  ;;  %v1358_v6 = vadd.f32 %v1282_v58, %v1136_v63 }
 0x177   : > { %v1284_v60 = vpop.f32.mrf.mxu0  ;;  %v1360_v7 = vadd.f32 %v1353_v57, %v1207_v0 }
 0x178   : > { %v1355_v59 = vpop.f32.mrf.mxu1  ;;  %v1359_v9 = vadd.f32 %v1284_v60, %v1138_v1 }
 0x179   : > { %1901 = vrot.lane.b32.xlu1 %v2672_v42, %s2340_s14  ;;  %1915 = vrot.lane.b32.xlu0 %v2687_v47, %s2346_s11  ;;  %v1441_v62 = vpop.f32.mrf.mxu0  ;;  %v1361_v10 = vadd.f32 %v1355_v59, %v1209_v2 }
 0x17a   : > { %v1512_v61 = vpop.f32.mrf.mxu1  ;;  %v1517_v12 = vadd.f32 %v1441_v62, %v1358_v6 }
 0x17b   : > { %v1443_v4 = vpop.f32.mrf.mxu0  ;;  %v1519_v5 = vadd.f32 %v1512_v61, %v1360_v7 }
 0x17c   : > { %v1514_v3 = vpop.f32.mrf.mxu1  ;;  %v1518_v14 = vadd.f32 %v1443_v4, %v1359_v9 }
 0x17d   : > { %1955 = vrot.lane.b32.xlu1 %v2680_v45, %s2340_s14  ;;  %1969 = vrot.lane.b32.xlu0 %v2693_v48, %s2346_s11  ;;  %v1520_v16 = vadd.f32 %v1514_v3, %v1361_v10 }
 0x181   : > { %1921 = vrot.lane.b32.xlu1 %v2687_v47, %s2340_s14  ;;  %1909 = vrot.lane.b32.xlu0 %v2687_v47, %s2345_s10 }
 0x185   : > { %1975 = vrot.lane.b32.xlu1 %v2693_v48, %s2340_s14  ;;  %1963 = vrot.lane.b32.xlu0 %v2693_v48, %s2345_s10 }
 0x1c9   : > { %v1601_v8 = vpop.f32.mrf.mxu0 }
 0x1ca   : > { %v1677_v15 = vadd.f32 %v1601_v8, %v1517_v12 }
 0x1cb   : > { %v1603_v13 = vpop.f32.mrf.mxu0 }
 0x1cc   : > { %v1678_v19 = vadd.f32 %v1603_v13, %v1518_v14 }
 0x1cd   : > { %v1672_v11 = vpop.f32.mrf.mxu1 }
 0x1ce   : > { %v1679_v20 = vadd.f32 %v1672_v11, %v1519_v5 }
 0x1cf   : > { %v1674_v17 = vpop.f32.mrf.mxu1 }
 0x1d0   : > { %v1680_v24 = vadd.f32 %v1674_v17, %v1520_v16 }
 0x1d5   : > { %v1764_v18 = vpop.f32.mrf.mxu0 }
 0x1d6   : > { %v1840_v21 = vadd.f32 %v1764_v18, %v1677_v15  ;;  %v1835_v22 = vpop.f32.mrf.mxu1 }
 0x1d7   : > { %v1766_v23 = vpop.f32.mrf.mxu0  ;;  %v1842_v26 = vadd.f32 %v1835_v22, %v1679_v20 }
 0x1d8   : > { %v1868_v25 = vadd.f32 %v2663_v27, %v1840_v21  ;;  %v1841_v28 = vadd.f32 %v1766_v23, %v1678_v19  ;;  %v1837_v29 = vpop.f32.mrf.mxu1 }
 0x1d9   : > { %v1843_v33 = vadd.f32 %v1837_v29, %v1680_v24  ;;  %v1870_v34 = vadd.f32 %v2663_v27, %v1842_v26 }
 0x1da   : > { %v1876_v30 = vmul.f32 %v1868_v25, %v2665_v32  ;;  %v1869_v31 = vadd.f32 %v2663_v27, %v1841_v28  ;;  %vm1872_vm13 = vcmp.ge.f32.partialorder %v1868_v25, 0.0 }
 0x1db   : > { %v1871_v37 = vadd.f32 %v2663_v27, %v1843_v33  ;;  %v1878_v39 = vmul.f32 %v1870_v34, %v2665_v32  ;;  %vm1874_vm15 = vcmp.ge.f32.partialorder %v1870_v34, 0.0 }
 0x1dc   : > { %v1877_v35 = vmul.f32 %v1869_v31, %v2665_v32  ;;  %v1880_v36 = vsel %vm1872_vm13, %v1868_v25, %v1876_v30  ;;  %vm1873_vm14 = vcmp.ge.f32.partialorder %v1869_v31, 0.0 }
 0x1dd   : > { %1885 = vrot.lane.b32.xlu0 %v1880_v36, %s2345_s10  ;;  %v1879_v40 = vmul.f32 %v1871_v37, %v2665_v32  ;;  %vm1875_vm1 = vcmp.ge.f32.partialorder %v1871_v37, 0.0  ;;  %v1882_v41 = vsel %vm1874_vm15, %v1870_v34, %v1878_v39 }
 0x1de   : > { %v1881_v38 = vsel %vm1873_vm14, %v1869_v31, %v1877_v35 }
 0x1df   : > { %1905 = vrot.lane.b32.xlu1 %v1881_v38, %s2345_s10  ;;  %v2720_v43 = vsel %vm1875_vm1, %v1871_v37, %v1879_v40 }
 0x1e1   : > { %1898 = vrot.lane.b32.xlu0 %v1880_v36, %s2340_s14 }
 0x1e3   : > { %1918 = vrot.lane.b32.xlu1 %v1881_v38, %s2340_s14  ;;  %v1890_v27 = vpop.permute.xlu0 %1889  ;;  %v1896_v32 = vpop.permute.xlu1 %1895 }
 0x1e5   : > { %1939 = vrot.lane.b32.xlu0 %v1882_v41, %s2345_s10 }
 0x1e7   : > { %1959 = vrot.lane.b32.xlu1 %v2720_v43, %s2345_s10  ;;  %v1944_v44 = vpop.permute.xlu0 %1943  ;;  %v1950_v46 = vpop.permute.xlu1 %1949 }
 0x1e9   : > { %1952 = vrot.lane.b32.xlu0 %v1882_v41, %s2340_s14 }
 0x1eb   : > { %1972 = vrot.lane.b32.xlu1 %v2720_v43, %s2340_s14  ;;  %v1916_v49 = vpop.permute.xlu0 %1915  ;;  %v1902_v50 = vpop.permute.xlu1 %1901  ;;  %s262_s14 = sand.u32 1, %s2322_s21  }
 0x1ec   : > { %s2123_s12 = sshll.u32 %s262_s14, 5  ;;  %s2011_s23 = scalar_lea.sflag [#allocation4], %s262_s14 }
 0x1ed   : > { %1892 = vrot.lane.b32.xlu0 %v1880_v36, %s2346_s11  ;;  %s264_s13 = scalar_lea.vmem [#allocation3], %s2123_s12 }
 0x1ee   : > { %s2027_s16 = sshll.u32 %s264_s13, 4  ;;  %s2028_s16 = int_to_ptr.vmem [resolvable:$true] %s2027_s16 }
 0x1ef   : > { %1912 = vrot.lane.b32.xlu1 %v1881_v38, %s2346_s11  ;;  %v1970_v51 = vpop.permute.xlu0 %1969  ;;  %v1956_v52 = vpop.permute.xlu1 %1955  ;;  %s2262_s4 = scalar_lea.vmem %s2028_s16, 512  ;;  %p2269_p1 = scmp.lt.s32.totalorder %s2028_s16, %s2267_s28 }
 0x1f0   : > { %p2263_p12 = scmp.ne.s32.totalorder %s2028_s16, %s2262_s4  ;;  %p2270_p2 = scmp.lt.s32.totalorder %s2268_s30, %s2262_s4 }
 0x1f1   : > { %1946 = vrot.lane.b32.xlu0 %v1882_v41, %s2346_s11 }
 0x1f2   : > { %p2264_p13 = pnand %p2263_p12, %p2421_p4  ;;  %p2271_p3 = por %p2270_p2, %p2269_p1 }
 0x1f3   : > { %1966 = vrot.lane.b32.xlu1 %v2720_v43, %s2346_s11  ;;  %v1910_v53 = vpop.permute.xlu0 %1909  ;;  %v1922_v54 = vpop.permute.xlu1 %1921 }
 0x1f4   : > { %p2265_p0 = pneg %p2264_p13 }
 0x1f6   : > { %p2272_p5 = pnand %p2271_p3, %p2265_p0 }
 0x1f7   : > { %v1964_v55 = vpop.permute.xlu0 %1963  ;;  %v1976_v56 = vpop.permute.xlu1 %1975 }
 0x24f   : > { %v1886_v57 = vpop.permute.xlu0 %1885 }
 0x250   : > { %v1925_v1 = vsel %vm1924_vm2, %v2672_v42, %v1886_v57 }
 0x251   : > { %v1906_v58 = vpop.permute.xlu1 %1905  ;;  %v1927_v9 = vsel %vm1926_vm3, %v1925_v1, %v1890_v27 }
 0x252   : > { %v1932_v6 = vsel %vm1924_vm2, %v2687_v47, %v1906_v58 }
 0x253   : > { %v1899_v59 = vpop.permute.xlu0 %1898  ;;  %v1933_v15 = vsel %vm1926_vm3, %v1932_v6, %v1910_v53 }
 0x254   : > { %v1929_v63 = vsel %vm1924_vm2, %v1896_v32, %v1899_v59 }
 0x255   : > { %v1919_v60 = vpop.permute.xlu1 %1918  ;;  %v1930_v3 = vsel %vm1926_vm3, %v1929_v63, %v1902_v50 }
 0x256   : > { %v1935_v2 = vsel %vm1924_vm2, %v1916_v49, %v1919_v60  ;;  %v1931_v12 = vsel %vm398_vm0, %v1930_v3, %v1880_v36 }
 0x257   : > { %v1940_v61 = vpop.permute.xlu0 %1939  ;;  %v1936_v8 = vsel %vm1926_vm3, %v1935_v2, %v1922_v54 }
 0x258   : > { %v1978_v42 = vsel %vm1924_vm2, %v2680_v45, %v1940_v61  ;;  %v1937_v45 = vsel %vm398_vm0, %v1936_v8, %v1881_v38 }
 0x259   : > { %v1960_v62 = vpop.permute.xlu1 %1959  ;;  %v1979_v20 = vsel %vm1926_vm3, %v1978_v42, %v1944_v44 }
 0x25a   : > { %v1984_v16 = vsel %vm1924_vm2, %v2693_v48, %v1960_v62 }
 0x25b   : > { %v1953_v0 = vpop.permute.xlu0 %1952  ;;  %v1985_v25 = vsel %vm1926_vm3, %v1984_v16, %v1964_v55 }
 0x25c   : > { %v1981_v7 = vsel %vm1924_vm2, %v1950_v46, %v1953_v0 }
 0x25d   : > { %v1973_v4 = vpop.permute.xlu1 %1972  ;;  %v1982_v13 = vsel %vm1926_vm3, %v1981_v7, %v1956_v52 }
 0x25e   : > { %v1987_v11 = vsel %vm1924_vm2, %v1970_v51, %v1973_v4  ;;  %v1983_v22 = vsel %vm398_vm0, %v1982_v13, %v1882_v41 }
 0x25f   : > { %v1893_v10 = vpop.permute.xlu0 %1892  ;;  %v1988_v18 = vsel %vm1926_vm3, %v1987_v11, %v1976_v56 }
 0x260   : > { %v1928_v5 = vsel %vm398_vm0, %v1927_v9, %v1893_v10  ;;  %v1989_v28 = vsel %vm398_vm0, %v1988_v18, %v2720_v43 }
 0x261   : > { %v1998_v47 = vcombine.low %v1928_v5, %v1931_v12  ;;  %v1913_v14 = vpop.permute.xlu1 %1912 }
 0x262   : > { %v1934_v17 = vsel %vm398_vm0, %v1933_v15, %v1913_v14 }
 0x263   : > { %2006 = vst [vmem:[%s264_s13] sm:$0xff] %v1998_v47  ;;  %v1999_v19 = vcombine.low %v1934_v17, %v1937_v45  ;;  %v1947_v21 = vpop.permute.xlu0 %1946 }
 0x264   : > { %v1980_v23 = vsel %vm398_vm0, %v1979_v20, %v1947_v21 }
 0x265   : > { %2007 = vst [vmem:[%s264_s13 + $0x8] sm:$0xff] %v1999_v19  ;;  %v2000_v48 = vcombine.low %v1980_v23, %v1983_v22  ;;  %v1967_v24 = vpop.permute.xlu1 %1966 }
 0x266   : > { %v1986_v26 = vsel %vm398_vm0, %v1985_v25, %v1967_v24 }
 0x267   : > { %2008 = vst [vmem:[%s264_s13 + $0x10] sm:$0xff] %v2000_v48  ;;  %v2001_v29 = vcombine.low %v1986_v26, %v1989_v28 }
 0x269   : > { %2009 = vst [vmem:[%s264_s13 + $0x18] sm:$0xff] %v2001_v29 }
 0x26a   : > { %2275 = shalt.err (!%p2272_p5)
}
 0x26b   : > { %s2276_s8 = scalar_lea.hbm %s2025_s19, 512  ;;  %s2280_s11 = scalar_lea.hbm %s2809_s5, 1024 }
 0x26c   : > { %p2277_p6 = scmp.ne.s32.totalorder %s2025_s19, %s2276_s8  ;;  %p2281_p10 = scmp.lt.s32.totalorder %s2025_s19, %s2809_s5 }
 0x26d   : > { %p2282_p11 = scmp.lt.s32.totalorder %s2280_s11, %s2276_s8 }
 0x26e   : > { %p2278_p7 = pnand %p2277_p6, %p2421_p4 }
 0x26f   : > { %p2283_p12 = por %p2282_p11, %p2281_p10 }
 0x270   : > { %p2279_p9 = pneg %p2278_p7 }
 0x272   : > { %p2284_p13 = pnand %p2283_p12, %p2279_p9 }
 0x274   : > { %2287 = shalt.err (!%p2284_p13)
}
 0x275   : > { %2196 = dma.vmem_to_hbm [thread:$0]  (%p2421_p4), %s2028_s16, 512, %s2025_s19, %s2011_s23  }
 0x276 PF: > { %p2202_p0 = scmp.ge.s32.totalorder %s2338_s25, 2  ;;  %s2039_s13 = sand.u32 1, %s2318_s20  }
 0x277   : > { %s2040_s15 = scalar_lea.sflag [#allocation4], %s2039_s13 }
 0x278   : > { %p2199_p1 = pnand %p2202_p0, %p2428_p8 }
 0x27a   : > { %p2200_p2 = pneg %p2199_p1 }
 0x27c   : > { %2313 = dma.done.wait (%p2200_p2), %s2040_s15, 512  }
 0x27d   : > { %2315 = vsyncadd (%p2200_p2), %s2040_s15, 4294966784  ;;  %s19_s25 = sadd.s32 1, %s2338_s25   ;;  %s2820_s20 = smov %s2322_s21 }
 0x27e   : > { %p16_p3 = scmp.ge.s32.totalorder %s19_s25, 4   ;;  %s2821_s21 = smov %s2326_s22 }
 0x27f   : > { %s2822_s22 = smov %s2434_s7  ;;  %s2823_s23 = smov %s2334_s24 }
 0x280   : > { %s2824_s24 = smov %s2826_s27  ;;  %18 = sbr.rel (!%p16_p3) target bundleno = 6 (0x6), region = 86 }
 0x285   :  { %2045 = vsyncpa [#allocation4], 1 }
 0x286   :  { %2047 = vsyncpa [#allocation4 + $0x1], 1 }

</bundles_post_ra>
